<compile_context>
chip_gen: v7x
topology: tpu7x:2x2x1
jax: 0.10.0
libtpu: 0.0.40
codegen_flags: <defaults>
</compile_context>

<pallas_src>
import jax
import jax.numpy as jnp
from jax.experimental import pallas as pl
from jax.experimental.pallas import tpu as pltpu

HIDDEN = 128
N_CLASSES = 10
N_CLASSES_PAD = 128  # lane-dense padded class dimension (full 128-lane tile)

_VMEM_BUDGET_BYTES = 24 * 1024 * 1024  # leave headroom under the 32 MiB scoped limit


def _round_up(x, m):
    return ((x + m - 1) // m) * m


def _choose_bm(B, D):
    """Batch tile: multiple of 8, <=1024, within VMEM budget, >=2 blocks for v7x."""
    # Resident operands (assume double-buffered by Pallas): W1, W2, b1, b2.
    weight_bytes = 2 * (D * HIDDEN * 2 + HIDDEN * N_CLASSES_PAD * 2
                        + HIDDEN * 4 + N_CLASSES_PAD * 4)
    # Streamed per batch row: f32 x + f32 out, each double-buffered.
    per_row = 2 * D * 4 + 2 * N_CLASSES_PAD * 4
    bm_cap = max(8, ((_VMEM_BUDGET_BYTES - weight_bytes) // per_row) // 8 * 8)
    bm = min(1024, _round_up(B, 8), bm_cap)
    # v7x has 2 TensorCores sharing the "parallel" batch axis; guarantee at
    # least two blocks whenever the batch is big enough to split.
    if B > 8 and pl.cdiv(B, bm) < 2:
        bm = min(bm, _round_up(pl.cdiv(B, 2), 8))
    return bm


def mlp_kernel(x_ref, w1_ref, b1_ref, w2_ref, b2_ref, o_ref):
    """(BM, D) f32 x -> (BM, 128) f32 padded logits."""
    # fc1: cast x f32->bf16 on the VPU (x is read from HBM once, as f32).
    h = jnp.dot(x_ref[...].astype(jnp.bfloat16), w1_ref[...],
                preferred_element_type=jnp.float32)
    h = jnp.maximum(h + b1_ref[...], 0.0)          # bias + ReLU in f32 (VPU)
    logits = jnp.dot(h.astype(jnp.bfloat16), w2_ref[...],
                     preferred_element_type=jnp.float32)
    o_ref[...] = (logits + b2_ref[...]).astype(o_ref.dtype)


def mlp_argmax_kernel(x_ref, w1_ref, b1_ref, w2_ref, b2_ref, o_ref):
    """Same MLP, fused argmax over the 10 real classes -> (BM, 1) int32."""
    h = jnp.dot(x_ref[...].astype(jnp.bfloat16), w1_ref[...],
                preferred_element_type=jnp.float32)
    h = jnp.maximum(h + b1_ref[...], 0.0)
    logits = jnp.dot(h.astype(jnp.bfloat16), w2_ref[...],
                     preferred_element_type=jnp.float32) + b2_ref[...]
    lane = jax.lax.broadcasted_iota(jnp.int32, logits.shape, 1)
    # Padded class lanes (>=10) hold exactly 0.0; mask them to -inf so they
    # can never win the argmax.
    masked = jnp.where(lane < N_CLASSES, logits, -jnp.inf)
    row_max = jnp.max(masked, axis=-1, keepdims=True)
    idx = jnp.where(masked == row_max, lane, N_CLASSES_PAD)
    o_ref[...] = jnp.min(idx, axis=-1, keepdims=True)  # first max (torch tie rule)


def prepare_params(w1, b1, w2, b2):
    """One-time weight prep (keep OUT of the per-call path): bf16 + class pad."""
    w1_b = jnp.asarray(w1, jnp.bfloat16)                                   # (D, 128)
    w2_b = jnp.zeros((HIDDEN, N_CLASSES_PAD), jnp.bfloat16).at[:, :N_CLASSES].set(
        jnp.asarray(w2, jnp.bfloat16))                                     # (128, 128)
    b1_f = jnp.asarray(b1, jnp.float32).reshape(1, HIDDEN)
    b2_f = jnp.zeros((1, N_CLASSES_PAD), jnp.float32).at[:, :N_CLASSES].set(
        jnp.asarray(b2, jnp.float32).reshape(1, N_CLASSES))
    return w1_b, b1_f, w2_b, b2_f


def _run_mlp(kernel, x_flat, params, out_cols, out_dtype):
    w1_b, b1_f, w2_b, b2_f = params
    B, D = x_flat.shape
    BM = _choose_bm(B, D)
    n_blocks = pl.cdiv(B, BM)

    flops = 2 * B * D * HIDDEN + 2 * B * HIDDEN * N_CLASSES_PAD
    bytes_accessed = (B * D * 4                               # x (f32, read once)
                      + D * HIDDEN * 2                        # W1 (bf16)
                      + HIDDEN * N_CLASSES_PAD * 2            # W2 (bf16)
                      + (HIDDEN + N_CLASSES_PAD) * 4          # biases
                      + B * out_cols * jnp.dtype(out_dtype).itemsize)

    return pl.pallas_call(
        kernel,
        out_shape=jax.ShapeDtypeStruct((B, out_cols), out_dtype),
        grid=(n_blocks,),
        in_specs=[
            pl.BlockSpec((BM, D), lambda i: (i, 0)),                  # x (streamed)
            pl.BlockSpec((D, HIDDEN), lambda i: (0, 0)),              # W1 (resident)
            pl.BlockSpec((1, HIDDEN), lambda i: (0, 0)),              # b1 (resident)
            pl.BlockSpec((HIDDEN, N_CLASSES_PAD), lambda i: (0, 0)),  # W2 (resident)
            pl.BlockSpec((1, N_CLASSES_PAD), lambda i: (0, 0)),       # b2 (resident)
        ],
        out_specs=pl.BlockSpec((BM, out_cols), lambda i: (i, 0)),
        compiler_params=pltpu.CompilerParams(
            dimension_semantics=("parallel",),
            vmem_limit_bytes=32 * 1024 * 1024,
        ),
        cost_estimate=pl.CostEstimate(
            flops=flops, transcendentals=0, bytes_accessed=bytes_accessed),
    )(x_flat, w1_b, b1_f, w2_b, b2_f)


@jax.jit
def netmlp_forward(x_nchw, params):
    """x_nchw: (B, C, H, W) f32. Returns logits (B, N_CLASSES) f32."""
    B = x_nchw.shape[0]
    x_flat = x_nchw.reshape(B, -1)  # torch.flatten(x, 1); metadata-only reshape
    out = _run_mlp(mlp_kernel, x_flat, params, N_CLASSES_PAD, jnp.float32)
    return out[:, :N_CLASSES]


@jax.jit
def netmlp_predict2(x_nchw, params):
    """PyTorch predict2: argmax over classes, fused into the kernel."""
    B = x_nchw.shape[0]
    x_flat = x_nchw.reshape(B, -1)
    idx = _run_mlp(mlp_argmax_kernel, x_flat, params, 1, jnp.int32)
    return idx.reshape(B)


def init_params(key, image_size, nchannels, hidden=HIDDEN, n_classes=N_CLASSES):
    """Deterministic init mimicking nn.Linear default (uniform +-1/sqrt(fan_in))."""
    D = image_size * image_size * nchannels
    k1, k2, k3, k4 = jax.random.split(key, 4)
    bound1 = 1.0 / jnp.sqrt(jnp.float32(D))
    bound2 = 1.0 / jnp.sqrt(jnp.float32(hidden))
    # stored transposed relative to PyTorch's (out, in): here (in, out)
    w1 = jax.random.uniform(k1, (D, hidden), jnp.float32, -bound1, bound1)
    b1 = jax.random.uniform(k2, (1, hidden), jnp.float32, -bound1, bound1)
    w2 = jax.random.uniform(k3, (hidden, n_classes), jnp.float32, -bound2, bound2)
    b2 = jax.random.uniform(k4, (1, n_classes), jnp.float32, -bound2, bound2)
    return w1, b1, w2, b2


# TODO(synk): nn.CrossEntropyLoss (self.criterion) is training-only and not part
# of forward/predict2; it is not implemented here.

if __name__ == "__main__":
    key = jax.random.PRNGKey(0)
    k_x, k_p = jax.random.split(key)

    # small shapes consistent with the module's forward
    batch, nchannels, image_size = 2, 4, 16
    x = jax.random.normal(k_x, (batch, nchannels, image_size, image_size),
                          dtype=jnp.float32)

    w1, b1, w2, b2 = init_params(k_p, image_size, nchannels)
    params = prepare_params(w1, b1, w2, b2)  # one-time prep, outside the hot path

    logits = jax.block_until_ready(netmlp_forward(x, params))
    assert logits.shape == (batch, N_CLASSES)

    # Reference in plain JAX using the same bf16-rounded operands + f32 accum
    # (matches the kernel's MXU numerics to within tolerance).
    x_flat = x.reshape(batch, -1)
    xr = x_flat.astype(jnp.bfloat16).astype(jnp.float32)
    w1r = w1.astype(jnp.bfloat16).astype(jnp.float32)
    w2r = w2.astype(jnp.bfloat16).astype(jnp.float32)
    h = jnp.maximum(xr @ w1r + b1.reshape(1, -1), 0.0)
    ref = h.astype(jnp.bfloat16).astype(jnp.float32) @ w2r + b2.reshape(1, -1)
    assert jnp.allclose(logits, ref, atol=2e-2, rtol=2e-2), (
        float(jnp.max(jnp.abs(logits - ref))))

    # predict2: fused in-kernel argmax must match argmax of the kernel's logits.
    preds = jax.block_until_ready(netmlp_predict2(x, params))
    assert preds.shape == (batch,)
    assert jnp.array_equal(preds, jnp.argmax(logits, axis=1))

    print("KERNEL_OK")
</pallas_src>

<mosaic_0001>
module attributes {stable_mosaic.version = 11 : i64} {
  func.func @mlp_kernel(%arg0: i32, %arg1: memref<8x1024xf32, #tpu.memory_space<vmem>>, %arg2: memref<1024x128xbf16, #tpu.memory_space<vmem>>, %arg3: memref<1x128xf32, #tpu.memory_space<vmem>>, %arg4: memref<128x128xbf16, #tpu.memory_space<vmem>>, %arg5: memref<1x128xf32, #tpu.memory_space<vmem>>, %arg6: memref<8x128xf32, #tpu.memory_space<vmem>>) attributes {dimension_semantics = [#tpu.dimension_semantics<parallel>], iteration_bounds = array<i64: 1>, scalar_prefetch = 0 : i64, scratch_operands = 0 : i64, tpu.core_type = #tpu.core_type<tc>, window_params = [{transform_indices = @transform_0, window_bounds = array<i64: 8, 1024>}, {pipeline_mode = #tpu.pipeline_mode<synchronous>, transform_indices = @transform_1, window_bounds = array<i64: 1024, 128>}, {pipeline_mode = #tpu.pipeline_mode<synchronous>, transform_indices = @transform_2, window_bounds = array<i64: 1, 128>}, {pipeline_mode = #tpu.pipeline_mode<synchronous>, transform_indices = @transform_3, window_bounds = array<i64: 128, 128>}, {pipeline_mode = #tpu.pipeline_mode<synchronous>, transform_indices = @transform_4, window_bounds = array<i64: 1, 128>}, {transform_indices = @transform_5, window_bounds = array<i64: 8, 128>}]} {
    %c0 = arith.constant 0 : index
    %c0_0 = arith.constant 0 : index
    %0 = vector.load %arg1[%c0, %c0_0] : memref<8x1024xf32, #tpu.memory_space<vmem>>, vector<8x1024xf32>
    %1 = arith.truncf %0 : vector<8x1024xf32> to vector<8x1024xbf16>
    %c0_1 = arith.constant 0 : index
    %c0_2 = arith.constant 0 : index
    %2 = vector.load %arg2[%c0_1, %c0_2] : memref<1024x128xbf16, #tpu.memory_space<vmem>>, vector<1024x128xbf16>
    %cst = arith.constant dense<0.000000e+00> : vector<8x128xf32>
    %3 = tpu.matmul %1, %2, %cst {dimension_numbers = #tpu.dot_dimension_numbers<[1], [0], [0], [1], [0, 0, 1, 1], [], []>} : vector<8x1024xbf16>, vector<1024x128xbf16>, vector<8x128xf32> -> vector<8x128xf32>
    %c0_3 = arith.constant 0 : index
    %c0_4 = arith.constant 0 : index
    %4 = vector.load %arg3[%c0_3, %c0_4] : memref<1x128xf32, #tpu.memory_space<vmem>>, vector<1x128xf32>
    %5 = vector.broadcast %4 : vector<1x128xf32> to vector<8x128xf32>
    %6 = arith.addf %3, %5 : vector<8x128xf32>
    %cst_5 = arith.constant 0.000000e+00 : f32
    %7 = vector.broadcast %cst_5 : f32 to vector<8x128xf32>
    %8 = arith.maximumf %6, %7 : vector<8x128xf32>
    %9 = arith.truncf %8 : vector<8x128xf32> to vector<8x128xbf16>
    %c0_6 = arith.constant 0 : index
    %c0_7 = arith.constant 0 : index
    %10 = vector.load %arg4[%c0_6, %c0_7] : memref<128x128xbf16, #tpu.memory_space<vmem>>, vector<128x128xbf16>
    %cst_8 = arith.constant dense<0.000000e+00> : vector<8x128xf32>
    %11 = tpu.matmul %9, %10, %cst_8 {dimension_numbers = #tpu.dot_dimension_numbers<[1], [0], [0], [1], [0, 0, 1, 1], [], []>} : vector<8x128xbf16>, vector<128x128xbf16>, vector<8x128xf32> -> vector<8x128xf32>
    %c0_9 = arith.constant 0 : index
    %c0_10 = arith.constant 0 : index
    %12 = vector.load %arg5[%c0_9, %c0_10] : memref<1x128xf32, #tpu.memory_space<vmem>>, vector<1x128xf32>
    %13 = vector.broadcast %12 : vector<1x128xf32> to vector<8x128xf32>
    %14 = arith.addf %11, %13 : vector<8x128xf32>
    %c0_11 = arith.constant 0 : index
    %c0_12 = arith.constant 0 : index
    %15 = vector.load %arg6[%c0_11, %c0_12] : memref<8x128xf32, #tpu.memory_space<vmem>>, vector<8x128xf32>
    tpu.vector_store %arg6[%c0_11, %c0_12], %14 {strides = array<i32>} : memref<8x128xf32, #tpu.memory_space<vmem>>, vector<8x128xf32>,
    return
  }
  func.func @transform_0(%arg0: i32) -> (i32, i32) {
    %c0_i32 = arith.constant 0 : i32
    %c0_i32_0 = arith.constant 0 : i32
    return %arg0, %c0_i32 : i32, i32
  }
  func.func @transform_1(%arg0: i32) -> (i32, i32) {
    %c0_i32 = arith.constant 0 : i32
    %c0_i32_0 = arith.constant 0 : i32
    %c0_i32_1 = arith.constant 0 : i32
    return %c0_i32, %c0_i32_0 : i32, i32
  }
  func.func @transform_2(%arg0: i32) -> (i32, i32) {
    %c0_i32 = arith.constant 0 : i32
    %c0_i32_0 = arith.constant 0 : i32
    %c0_i32_1 = arith.constant 0 : i32
    return %c0_i32, %c0_i32_0 : i32, i32
  }
  func.func @transform_3(%arg0: i32) -> (i32, i32) {
    %c0_i32 = arith.constant 0 : i32
    %c0_i32_0 = arith.constant 0 : i32
    %c0_i32_1 = arith.constant 0 : i32
    return %c0_i32, %c0_i32_0 : i32, i32
  }
  func.func @transform_4(%arg0: i32) -> (i32, i32) {
    %c0_i32 = arith.constant 0 : i32
    %c0_i32_0 = arith.constant 0 : i32
    %c0_i32_1 = arith.constant 0 : i32
    return %c0_i32, %c0_i32_0 : i32, i32
  }
  func.func @transform_5(%arg0: i32) -> (i32, i32) {
    %c0_i32 = arith.constant 0 : i32
    %c0_i32_0 = arith.constant 0 : i32
    return %arg0, %c0_i32 : i32, i32
  }
}

</mosaic_0001>

<bundles_post_ra>
// kernel: netmlp_forward.1
= control target key start
LH: loop header
LB: loop body
LE: loop exit
PB: predicated region body
PF: predicated region fallthrough
CT: control target
= control target key end

     0   :  { %10 = vsyncpa [#allocation3], 0  ;;  %s1409_s0 = inlined_call_operand.vmem [shape: f32[2,1024], index: 0, kind: input, shape index: {}]   ;;  %s1410_s1 = inlined_call_operand.hbm [shape: bf16[1024,128], index: 1, kind: input, shape index: {}]   ;;  %s1411_s2 = inlined_call_operand.vmem [shape: f32[1,128], index: 2, kind: input, shape index: {}]   ;;  %s1412_s3 = inlined_call_operand.vmem [shape: bf16[128,128], index: 3, kind: input, shape index: {}]   ;;  %s1413_s4 = inlined_call_operand.vmem [shape: f32[1,128], index: 4, kind: input, shape index: {}]   ;;  %s1414_s5 = inlined_call_operand.hbm [shape: f32[2,128], index: 5, kind: output, shape index: {}]  }
   0x1   :  { %11 = vsyncpa [#allocation4], 0  ;;  %s1282_s18 = smov [#allocation2]   ;;  %s1234_s22 = scalar_lea.hbm %s1410_s1, 8192 }
   0x2   :  { %s19_s19 = sshll.u32 %s1282_s18, 4  ;;  %p1235_p0 = scmp.ne.s32.totalorder %s1410_s1, %s1234_s22  ;;  %s20_s19 = int_to_ptr.vmem [resolvable:$true] %s19_s19 }
   0x3   :  { %p1238_p1 = scmp.lt.u32.totalorder %s1234_s22, %s1410_s1 }
   0x5   :  { %p1240_p2 = pnand %p1238_p1, %p1235_p0 }
   0x7   :  { %1243 = shalt.err (!%p1240_p2)
}
   0x8   :  { %s1244_s27 = scalar_lea.vmem %s20_s19, 8192  ;;  %p1249_p4 = scmp.lt.s32.totalorder %s20_s19, %s20_s19 }
   0x9   :  { %p1245_p3 = scmp.ne.s32.totalorder %s20_s19, %s1244_s27  ;;  %p1250_p5 = scmp.lt.s32.totalorder %s1244_s27, %s1244_s27 }
   0xb   :  { %p1251_p6 = por %p1250_p5, %p1249_p4 }
   0xd   :  { %p1252_p7 = pnand %p1251_p6, %p1245_p3 }
   0xf   :  { %1255 = shalt.err (!%p1252_p7)
}
  0x10   :  { %s1283_s28 = smov 64   ;;  %s1284_s29 = smov 4  }
  0x11   :  { %25 = dma.hbm_to_vmem [thread:$0]  %s1410_s1, 8192, %s20_s19, [#allocation3], %s1283_s28, %s1283_s28, %s1284_s29  }
  0x12   :  { %1278 = dma.done.wait [#allocation3], 8192  }
  0x13   :  { %1279 = vsyncadd [#allocation3], 4294959104  ;;  %v1150_v0 = vld [vmem:[#allocation2 + $0x40] sm:$0xff]   ;;  %v1154_v4 = vld [vmem:[#allocation2 + $0x48] sm:$0xff]   ;;  %v1285_v24 = vmov 1983009808   ;;  %v59_v26 = vlaneseq }
  0x14   :  { %v1151_v1 = vld [vmem:[#allocation2 + $0xc0] sm:$0xff]   ;;  %1024 = vmatprep.subr.bf16.mxu0 %v1150_v0  ;;  %v1155_v5 = vld [vmem:[#allocation2 + $0xc8] sm:$0xff]   ;;  %v1158_v8 = vld [vmem:[#allocation2 + $0x50] sm:$0xff]   ;;  %v57_v25 = vunpack.c.l.s4 %v1285_v24  ;;  %vm1287_vm0 = vmmov 0  }
  0x15   :  { %v1152_v2 = vld [vmem:[#allocation2] sm:$0xff]   ;;  %1046 = vmatprep.subr.bf16.mxu1 %v1151_v1  ;;  %v1156_v6 = vld [vmem:[#allocation2 + $0x8] sm:$0xff]   ;;  %v1159_v9 = vld [vmem:[#allocation2 + $0xd0] sm:$0xff]   ;;  %v60_v32 = vshrl.u32 %v59_v26, 7 }
  0x16   :  { %v1153_v3 = vld [vmem:[#allocation2 + $0x80] sm:$0xff]   ;;  %1025 = vmatpush3.bf16.msra.mxu0 %v1152_v2  ;;  %v1157_v7 = vld [vmem:[#allocation2 + $0x88] sm:$0xff]   ;;  %v1160_v10 = vld [vmem:[#allocation2 + $0x10] sm:$0xff]   ;;  %v58_v31 = vunpack.c.0.s8 %v57_v25 }
  0x17   :  { %1047 = vmatpush3.bf16.msra.mxu1 %v1153_v3  ;;  %1026 = vmatprep.subr.bf16.mxu0 %v1154_v4  ;;  %v1161_v11 = vld [vmem:[#allocation2 + $0x90] sm:$0xff]   ;;  %v1162_v12 = vld [vmem:[#allocation2 + $0x58] sm:$0xff]   ;;  %v1166_v16 = vld [vmem:[#allocation2 + $0x60] sm:$0xff]  }
  0x18   :  { %1048 = vmatprep.subr.bf16.mxu1 %v1155_v5  ;;  %v1163_v13 = vld [vmem:[#allocation2 + $0xd8] sm:$0xff]   ;;  %v1167_v17 = vld [vmem:[#allocation2 + $0xe0] sm:$0xff]   ;;  %v1170_v20 = vld [vmem:[#allocation2 + $0x68] sm:$0xff]   ;;  %v1333_v37 = vsub.s32 %v58_v31, %v60_v32 }
  0x19   :  { %v1164_v14 = vld [vmem:[#allocation2 + $0x18] sm:$0xff]   ;;  %v1168_v18 = vld [vmem:[#allocation2 + $0x20] sm:$0xff]   ;;  %v1171_v21 = vld [vmem:[#allocation2 + $0xe8] sm:$0xff]  }
  0x1a   :  { %1027 = vmatpush3.bf16.msra.mxu0 %v1156_v6  ;;  %v1165_v15 = vld [vmem:[#allocation2 + $0x98] sm:$0xff]   ;;  %v1169_v19 = vld [vmem:[#allocation2 + $0xa0] sm:$0xff]   ;;  %v1172_v22 = vld [vmem:[#allocation2 + $0x28] sm:$0xff]  }
  0x1b   :  { %1049 = vmatpush3.bf16.msra.mxu1 %v1157_v7  ;;  %1028 = vmatprep.subr.bf16.mxu0 %v1158_v8  ;;  %v1173_v23 = vld [vmem:[#allocation2 + $0xa8] sm:$0xff]   ;;  %v1174_v27 = vld [vmem:[#allocation2 + $0x70] sm:$0xff]   ;;  %v1178_v33 = vld [vmem:[#allocation2 + $0x78] sm:$0xff]  }
  0x1c   :  { %1050 = vmatprep.subr.bf16.mxu1 %v1159_v9  ;;  %v1175_v28 = vld [vmem:[#allocation2 + $0xf0] sm:$0xff]   ;;  %v1179_v34 = vld [vmem:[#allocation2 + $0xf8] sm:$0xff]   ;;  %v1188_v44 = vld [vmem:[#allocation2 + $0x140] sm:$0xff]  }
  0x1d   :  { %v1176_v29 = vld [vmem:[#allocation2 + $0x30] sm:$0xff]   ;;  %v1180_v35 = vld [vmem:[#allocation2 + $0x38] sm:$0xff]   ;;  %v1189_v47 = vld [vmem:[#allocation2 + $0x1c0] sm:$0xff]  }
  0x1e   :  { %1029 = vmatpush3.bf16.msra.mxu0 %v1160_v10  ;;  %v1177_v30 = vld [vmem:[#allocation2 + $0xb0] sm:$0xff]   ;;  %v1181_v36 = vld [vmem:[#allocation2 + $0xb8] sm:$0xff]   ;;  %v1190_v50 = vld [vmem:[#allocation2 + $0x100] sm:$0xff]  }
  0x1f   :  { %1051 = vmatpush3.bf16.msra.mxu1 %v1161_v11  ;;  %1030 = vmatprep.subr.bf16.mxu0 %v1162_v12  ;;  %v1182_v38 = vld [vmem:[%s1409_s0] ss:$16 sps:$4 sm:$0xff]   ;;  %v1186_v40 = vld [vmem:[%s1409_s0 + $0x4] ss:$16 sps:$4 sm:$0xff]   ;;  %v1192_v56 = vld [vmem:[#allocation2 + $0x148] sm:$0xff]  }
  0x20   :  { %1052 = vmatprep.subr.bf16.mxu1 %v1163_v13  ;;  %v1184_v39 = vld [vmem:[%s1409_s0 + $0x20] ss:$16 sps:$4 sm:$0xff]   ;;  %v1187_v41 = vld [vmem:[%s1409_s0 + $0x24] ss:$16 sps:$4 sm:$0xff]   ;;  %v62_v42 = vrot.slane %v1182_v38, %v1333_v37  ;;  %v69_v45 = vrot.slane %v1186_v40, %v1333_v37  ;;  %v1193_v59 = vld [vmem:[#allocation2 + $0x1c8] sm:$0xff]   ;;  %v1286_v40 = vmov 0.0  }
  0x21   :  { %v76_v43 = vrot.slane %v1184_v39, %v1333_v37  ;;  %v83_v46 = vrot.slane %v1187_v41, %v1333_v37  ;;  %v1191_v53 = vld [vmem:[#allocation2 + $0x180] sm:$0xff]   ;;  %v1194_v60 = vld [vmem:[#allocation2 + $0x108] sm:$0xff]   ;;  %v1196_v62 = vld [vmem:[#allocation2 + $0x150] sm:$0xff]  }
  0x22   :  { %1031 = vmatpush3.bf16.msra.mxu0 %v1164_v14  ;;  %v1195_v61 = vld [vmem:[#allocation2 + $0x188] sm:$0xff]   ;;  %v1197_v63 = vld [vmem:[#allocation2 + $0x1d0] sm:$0xff]   ;;  %v1200_v2 = vld [vmem:[#allocation2 + $0x158] sm:$0xff]  }
  0x23   :  { %1053 = vmatpush3.bf16.msra.mxu1 %v1165_v15  ;;  %1032 = vmatprep.subr.bf16.mxu0 %v1166_v16  ;;  %v85_v48 = vcombine.high %v62_v42, %v76_v43  ;;  %v84_v49 = vcombine.low %v62_v42, %v76_v43  ;;  %v87_v51 = vcombine.high %v69_v45, %v83_v46  ;;  %v1198_v0 = vld [vmem:[#allocation2 + $0x110] sm:$0xff]   ;;  %v1201_v3 = vld [vmem:[#allocation2 + $0x1d8] sm:$0xff]   ;;  %v1204_v6 = vld [vmem:[#allocation2 + $0x160] sm:$0xff]  }
  0x24   :  { %1054 = vmatprep.subr.bf16.mxu1 %v1167_v17  ;;  %v86_v52 = vcombine.low %v69_v45, %v83_v46  ;;  %v1199_v1 = vld [vmem:[#allocation2 + $0x190] sm:$0xff]   ;;  %v1202_v4 = vld [vmem:[#allocation2 + $0x118] sm:$0xff]   ;;  %v1205_v7 = vld [vmem:[#allocation2 + $0x1e0] sm:$0xff]  }
  0x25   :  { %v133_v54 = vpack.c.bf16 %v85_v48, %v85_v48  ;;  %v132_v55 = vpack.c.bf16 %v84_v49, %v84_v49  ;;  %v135_v57 = vpack.c.bf16 %v87_v51, %v87_v51  ;;  %v1203_v5 = vld [vmem:[#allocation2 + $0x198] sm:$0xff]   ;;  %v1206_v8 = vld [vmem:[#allocation2 + $0x120] sm:$0xff]   ;;  %v1208_v10 = vld [vmem:[#allocation2 + $0x168] sm:$0xff]  }
  0x26   :  { %1033 = vmatpush3.bf16.msra.mxu0 %v1168_v18  ;;  %v134_v58 = vpack.c.bf16 %v86_v52, %v86_v52  ;;  %v1207_v9 = vld [vmem:[#allocation2 + $0x1a0] sm:$0xff]   ;;  %v1209_v11 = vld [vmem:[#allocation2 + $0x1e8] sm:$0xff]   ;;  %v1212_v14 = vld [vmem:[#allocation2 + $0x170] sm:$0xff]  }
  0x27   :  { %1055 = vmatpush3.bf16.msra.mxu1 %v1169_v19  ;;  %1034 = vmatprep.subr.bf16.mxu0 %v1170_v20  ;;  %v1210_v12 = vld [vmem:[#allocation2 + $0x128] sm:$0xff]   ;;  %v1213_v15 = vld [vmem:[#allocation2 + $0x1f0] sm:$0xff]   ;;  %v1216_v18 = vld [vmem:[#allocation2 + $0x178] sm:$0xff]  }
  0x28   :  { %1056 = vmatprep.subr.bf16.mxu1 %v1171_v21  ;;  %691 = vmatprep.mubr.bf16.mxu0 %v133_v54  ;;  %v1211_v13 = vld [vmem:[#allocation2 + $0x1a8] sm:$0xff]   ;;  %v1214_v16 = vld [vmem:[#allocation2 + $0x130] sm:$0xff]   ;;  %v1217_v19 = vld [vmem:[#allocation2 + $0x1f8] sm:$0xff]  }
  0x29   :  { %731 = vmatprep.mubr.bf16.mxu1 %v135_v57  ;;  %v1215_v17 = vld [vmem:[#allocation2 + $0x1b0] sm:$0xff]   ;;  %v1218_v20 = vld [vmem:[#allocation2 + $0x138] sm:$0xff]   ;;  %v1226_v39 = vld [vmem:[%s1412_s3] sm:$0xff]  }
  0x2a   :  { %1035 = vmatpush3.bf16.msra.mxu0 %v1172_v22  ;;  %v1219_v21 = vld [vmem:[#allocation2 + $0x1b8] sm:$0xff]   ;;  %v1228_v41 = vld [vmem:[%s1412_s3 + $0x10] sm:$0xff]   ;;  %v1230_v43 = vld [vmem:[%s1412_s3 + $0x20] sm:$0xff]  }
  0x2b   :  { %1057 = vmatpush3.bf16.msra.mxu1 %v1173_v23  ;;  %1036 = vmatprep.subr.bf16.mxu0 %v1174_v27  ;;  %v1220_v22 = vld [vmem:[%s1409_s0 + $0x8] ss:$16 sps:$4 sm:$0xff]   ;;  %v1224_v24 = vld [vmem:[%s1409_s0 + $0xc] ss:$16 sps:$4 sm:$0xff]   ;;  %v1232_v45 = vld [vmem:[%s1412_s3 + $0x30] sm:$0xff]  }
  0x2c   :  { %1058 = vmatprep.subr.bf16.mxu1 %v1175_v28  ;;  %v1222_v23 = vld [vmem:[%s1409_s0 + $0x28] ss:$16 sps:$4 sm:$0xff]   ;;  %v1225_v25 = vld [vmem:[%s1409_s0 + $0x2c] ss:$16 sps:$4 sm:$0xff]   ;;  %v98_v26 = vrot.slane %v1220_v22, %v1333_v37  ;;  %v105_v28 = vrot.slane %v1224_v24, %v1333_v37  ;;  %v950_v49 = vld [vmem:[%s1411_s2] ss:$0 sm:$0xff] }
  0x2d   :  { %v112_v27 = vrot.slane %v1222_v23, %v1333_v37  ;;  %v1229_v42 = vld [vmem:[%s1412_s3 + $0x18] sm:$0xff]  }
  0x2e   :  { %1037 = vmatpush3.bf16.msra.mxu0 %v1176_v29  ;;  %v119_v29 = vrot.slane %v1225_v25, %v1333_v37  ;;  %v1227_v37 = vld [vmem:[%s1412_s3 + $0x8] sm:$0xff]   ;;  %v1233_v46 = vld [vmem:[%s1412_s3 + $0x38] sm:$0xff]  }
  0x2f   :  { %1059 = vmatpush3.bf16.msra.mxu1 %v1177_v30  ;;  %1038 = vmatprep.subr.bf16.mxu0 %v1178_v33  ;;  %v121_v30 = vcombine.high %v98_v26, %v112_v27  ;;  %v120_v31 = vcombine.low %v98_v26, %v112_v27 }
  0x30   :  { %1060 = vmatprep.subr.bf16.mxu1 %v1179_v34  ;;  %v123_v32 = vcombine.high %v105_v28, %v119_v29  ;;  %v122_v33 = vcombine.low %v105_v28, %v119_v29 }
  0x31   :  { %v137_v34 = vpack.c.bf16 %v121_v30, %v121_v30 }
  0x32   :  { %1039 = vmatpush3.bf16.msra.mxu0 %v1180_v35  ;;  %v136_v35 = vpack.c.bf16 %v120_v31, %v120_v31  ;;  %v138_v38 = vpack.c.bf16 %v122_v33, %v122_v33 }
  0x33   :  { %1061 = vmatpush3.bf16.msra.mxu1 %v1181_v36  ;;  %1068 = vmatprep.subr.bf16.mxu0 %v1188_v44  ;;  %v139_v36 = vpack.c.bf16 %v123_v32, %v123_v32  ;;  %v1231_v44 = vld [vmem:[%s1412_s3 + $0x28] sm:$0xff]  }
  0x34   :  { %1090 = vmatprep.subr.bf16.mxu1 %v1189_v47 }
  0x35   :  { %692 = vmatmul.mubr.bf16.vlgmr.msra.gmra.mrb[0].mxu0 %v132_v55 }
  0x36   :  { %732 = vmatmul.mubr.bf16.vlgmr.msra.gmra.mrb[0].mxu1 %v134_v58  ;;  %1069 = vmatpush3.bf16.msra.mxu0 %v1190_v50 }
  0x37   :  { %1091 = vmatpush3.bf16.msra.mxu1 %v1191_v53  ;;  %1070 = vmatprep.subr.bf16.mxu0 %v1192_v56 }
  0x38   :  { %1092 = vmatprep.subr.bf16.mxu1 %v1193_v59  ;;  %771 = vmatprep.mubr.bf16.mxu0 %v137_v34 }
  0x39   :  { %811 = vmatprep.mubr.bf16.mxu1 %v139_v36 }
  0x3a   :  { %1071 = vmatpush3.bf16.msra.mxu0 %v1194_v60 }
  0x3b   :  { %1093 = vmatpush3.bf16.msra.mxu1 %v1195_v61  ;;  %1072 = vmatprep.subr.bf16.mxu0 %v1196_v62 }
  0x3c   :  { %1094 = vmatprep.subr.bf16.mxu1 %v1197_v63 }
  0x3e   :  { %1073 = vmatpush3.bf16.msra.mxu0 %v1198_v0 }
  0x3f   :  { %1095 = vmatpush3.bf16.msra.mxu1 %v1199_v1  ;;  %1074 = vmatprep.subr.bf16.mxu0 %v1200_v2 }
  0x40   :  { %1096 = vmatprep.subr.bf16.mxu1 %v1201_v3 }
  0x42   :  { %1075 = vmatpush3.bf16.msra.mxu0 %v1202_v4 }
  0x43   :  { %1097 = vmatpush3.bf16.msra.mxu1 %v1203_v5  ;;  %1076 = vmatprep.subr.bf16.mxu0 %v1204_v6 }
  0x44   :  { %1098 = vmatprep.subr.bf16.mxu1 %v1205_v7 }
  0x46   :  { %1077 = vmatpush3.bf16.msra.mxu0 %v1206_v8 }
  0x47   :  { %1099 = vmatpush3.bf16.msra.mxu1 %v1207_v9  ;;  %1078 = vmatprep.subr.bf16.mxu0 %v1208_v10  ;;  %v1015_v10 = vld [vmem:[%s1413_s4] ss:$0 sm:$0xff] }
  0x48   :  { %1100 = vmatprep.subr.bf16.mxu1 %v1209_v11 }
  0x4a   :  { %1079 = vmatpush3.bf16.msra.mxu0 %v1210_v12 }
  0x4b   :  { %1101 = vmatpush3.bf16.msra.mxu1 %v1211_v13  ;;  %1080 = vmatprep.subr.bf16.mxu0 %v1212_v14 }
  0x4c   :  { %1102 = vmatprep.subr.bf16.mxu1 %v1213_v15 }
  0x4e   :  { %1081 = vmatpush3.bf16.msra.mxu0 %v1214_v16 }
  0x4f   :  { %1103 = vmatpush3.bf16.msra.mxu1 %v1215_v17  ;;  %1082 = vmatprep.subr.bf16.mxu0 %v1216_v18 }
  0x50   :  { %1104 = vmatprep.subr.bf16.mxu1 %v1217_v19 }
  0x52   :  { %1083 = vmatpush3.bf16.msra.mxu0 %v1218_v20 }
  0x53   :  { %1105 = vmatpush3.bf16.msra.mxu1 %v1219_v21  ;;  %1121 = vmatprep.subr.bf16.mxu0 %v1286_v40 }
  0x55   :  { %772 = vmatmul.mubr.bf16.vlgmr.msra.gmra.mrb[4].mxu0 %v136_v35 }
  0x56   :  { %812 = vmatmul.mubr.bf16.vlgmr.msra.gmra.mrb[4].mxu1 %v138_v38  ;;  %1122 = vmatpush3.bf16.msra.mxu0 %v1226_v39 }
  0x57   :  { %1123 = vmatprep.subr.bf16.mxu0 %v1286_v40  ;;  %1137 = vmatprep.mubr.msk.bf16.mxu0 %vm1287_vm0, %v1286_v40 }
  0x5a   :  { %1124 = vmatpush3.bf16.msra.mxu0 %v1227_v37 }
  0x5b   :  { %1125 = vmatprep.subr.bf16.mxu0 %v1286_v40 }
  0x5e   :  { %1126 = vmatpush3.bf16.msra.mxu0 %v1228_v41 }
  0x5f   :  { %1127 = vmatprep.subr.bf16.mxu0 %v1286_v40 }
  0x62   :  { %1128 = vmatpush3.bf16.msra.mxu0 %v1229_v42 }
  0x63   :  { %1129 = vmatprep.subr.bf16.mxu0 %v1286_v40 }
  0x66   :  { %1130 = vmatpush3.bf16.msra.mxu0 %v1230_v43 }
  0x67   :  { %1131 = vmatprep.subr.bf16.mxu0 %v1286_v40 }
  0x6a   :  { %1132 = vmatpush3.bf16.msra.mxu0 %v1231_v44 }
  0x6b   :  { %1133 = vmatprep.subr.bf16.mxu0 %v1286_v40 }
  0x6e   :  { %1134 = vmatpush3.bf16.msra.mxu0 %v1232_v45 }
  0x6f   :  { %1135 = vmatprep.subr.bf16.mxu0 %v1286_v40 }
  0x72   :  { %1136 = vmatpush3.bf16.msra.mxu0 %v1233_v46 }
 0x108   :  { %v1040_v47 = vpop.f32.mrb[0].mxu0 }
 0x109   :  { %v1062_v48 = vpop.f32.mrb[0].mxu1  ;;  %v1041_v50 = vpop.f32.mrb[1].mxu0 }
 0x10a   :  { %v1042_v51 = vadd.f32 %v1041_v50, %v1040_v47  ;;  %v1063_v52 = vpop.f32.mrb[1].mxu1  ;;  %v1043_v53 = vpop.f32.mrb[2].mxu0 }
 0x10b   :  { %v1064_v54 = vadd.f32 %v1063_v52, %v1062_v48  ;;  %v1065_v55 = vpop.f32.mrb[2].mxu1  ;;  %v1044_v56 = vpop.f32.mrb[3].mxu0 }
 0x10c   :  { %v694_v57 = vadd.f32 %v1042_v51, %v950_v49  ;;  %v1066_v58 = vpop.f32.mrb[3].mxu1 }
 0x10e   :  { %v734_v59 = vadd.f32 %v1064_v54, %v694_v57 }
 0x128   :  { %v1084_v60 = vpop.f32.mrb[4].mxu0 }
 0x129   :  { %v1106_v61 = vpop.f32.mrb[4].mxu1  ;;  %v1085_v62 = vpop.f32.mrb[5].mxu0 }
 0x12a   :  { %v1086_v63 = vadd.f32 %v1085_v62, %v1084_v60  ;;  %v1107_v0 = vpop.f32.mrb[5].mxu1  ;;  %v1087_v1 = vpop.f32.mrb[6].mxu0 }
 0x12b   :  { %v1108_v2 = vadd.f32 %v1107_v0, %v1106_v61  ;;  %v1109_v3 = vpop.f32.mrb[6].mxu1  ;;  %v1088_v4 = vpop.f32.mrb[7].mxu0 }
 0x12c   :  { %v774_v5 = vadd.f32 %v1086_v63, %v734_v59  ;;  %v1110_v6 = vpop.f32.mrb[7].mxu1 }
 0x12e   :  { %v814_v7 = vadd.f32 %v1108_v2, %v774_v5 }
 0x130   :  { %v819_v8 = vmax.f32 %v814_v7, 0.0 }
 0x132   :  { %v820_v9 = vpack.c.bf16 %v819_v8, %v819_v8 }
 0x134   :  { %1138 = vmatmul.mubr.bf16.vlgmr.msra.gmra.mrb[8].mxu0 %v820_v9 }
 0x207   :  { %v926_v11 = vpop.f32.mrb[8].mxu0 }
 0x208   :  { %v927_v12 = vadd.f32 %v1015_v10, %v926_v11  ;;  %v1139_v13 = vpop.f32.mrb[9].mxu0 }
 0x209   :  { %v929_v14 = vpop.f32.mrb[10].mxu0 }
 0x20a   :  { %932 = vst [vmem:[#allocation5] sm:$0xff] %v927_v12  ;;  %v1140_v15 = vpop.f32.mrb[11].mxu0 }
 0x20b   :  { %937 = vsyncadd [#allocation4], 96  ;;  %s1288_s13 = smov [#allocation5]  }
 0x20c   :  { %s938_s14 = sshll.u32 %s1288_s13, 4  ;;  %s939_s14 = int_to_ptr.vmem [resolvable:$true] %s938_s14 }
 0x20d   :  { %s1256_s15 = scalar_lea.vmem %s939_s14, 32  ;;  %s1260_s16 = scalar_lea.vmem %s939_s14, 128 }
 0x20e   :  { %p1257_p8 = scmp.ne.s32.totalorder %s939_s14, %s1256_s15  ;;  %p1261_p9 = scmp.lt.s32.totalorder %s939_s14, %s939_s14 }
 0x20f   :  { %p1262_p10 = scmp.lt.s32.totalorder %s1260_s16, %s1256_s15 }
 0x211   :  { %p1263_p11 = por %p1262_p10, %p1261_p9 }
 0x213   :  { %p1264_p12 = pnand %p1263_p11, %p1257_p8 }
 0x215   :  { %1267 = shalt.err (!%p1264_p12)
}
 0x216   :  { %s1268_s18 = scalar_lea.hbm %s1414_s5, 32 }
 0x217   :  { %p1269_p13 = scmp.ne.s32.totalorder %s1414_s5, %s1268_s18  ;;  %p1272_p0 = scmp.lt.u32.totalorder %s1268_s18, %s1414_s5 }
 0x219   :  { %p1274_p1 = pnand %p1272_p0, %p1269_p13 }
 0x21b   :  { %1277 = shalt.err (!%p1274_p1)
}
 0x21c   :  { %s1289_s22 = smov 32   ;;  %s1290_s23 = smov 2  }
 0x21d   :  { %944 = dma.vmem_to_hbm [thread:$0]  %s939_s14, 32, %s1414_s5, [#allocation4], %s1289_s22, %s1289_s22, %s1290_s23  }
 0x21e   :  { %1280 = dma.done.wait [#allocation4], 128  }
 0x21f   :  { %1281 = vsyncadd [#allocation4], 4294967168 }
 0x220   :  { %948 = vsyncpa [#allocation3], 1 }
 0x221   :  { %949 = vsyncpa [#allocation4], 1 }

</bundles_post_ra>
